<compile_context>
chip_gen: v6e
topology: v6e:2x2x1
jax: 0.10.0
libtpu: 0.0.40
codegen_flags: <defaults>
</compile_context>

<pallas_src>
import functools

import jax
import jax.numpy as jnp
from jax.experimental import pallas as pl
from jax.experimental.pallas import tpu as pltpu


# ---------------------------------------------------------------------------
# Tiled linear (no bias): bf16 operands, f32 accumulation
# ---------------------------------------------------------------------------

def _matmul_kernel(x_ref, w_ref, o_ref, acc_ref):
    @pl.when(pl.program_id(2) == 0)
    def _():
        acc_ref[...] = jnp.zeros_like(acc_ref)

    acc_ref[...] += jnp.dot(x_ref[...], w_ref[...],
                            preferred_element_type=jnp.float32)

    @pl.when(pl.program_id(2) == pl.num_programs(2) - 1)
    def _():
        o_ref[...] = acc_ref[...].astype(o_ref.dtype)


def matmul_pallas(x, w, *, tm=256, tn=256, tk=512):
    """(M, K) @ (K, N) -> (M, N) f32.  bf16 MXU inputs, f32 accumulator scratch."""
    M, K = x.shape
    N = w.shape[1]
    x = x.astype(jnp.bfloat16)
    w = w.astype(jnp.bfloat16)
    bm = tm if M % tm == 0 else M
    bn = tn if N % tn == 0 else N
    bk = tk if K % tk == 0 else K
    return pl.pallas_call(
        _matmul_kernel,
        grid=(M // bm, N // bn, K // bk),
        in_specs=[pl.BlockSpec((bm, bk), lambda i, j, k: (i, k)),
                  pl.BlockSpec((bk, bn), lambda i, j, k: (k, j))],
        out_specs=pl.BlockSpec((bm, bn), lambda i, j, k: (i, j)),
        out_shape=jax.ShapeDtypeStruct((M, N), jnp.float32),
        scratch_shapes=[pltpu.VMEM((bm, bn), jnp.float32)],
        compiler_params=pltpu.CompilerParams(
            dimension_semantics=("parallel", "parallel", "arbitrary")),
    )(x, w)


# ---------------------------------------------------------------------------
# Raw positional scores BD = q_scaled @ r_k^T  (per batch, per head; r not
# broadcast over batch — indexed per head via the BlockSpec index_map)
# ---------------------------------------------------------------------------

def _bd_kernel(q_ref, r_ref, o_ref):
    q = q_ref[0, 0]                                   # (qlen, D) bf16 (pre-scaled)
    r = r_ref[0]                                      # (rlen, D) bf16
    o_ref[0, 0] = jax.lax.dot_general(
        q, r, (((1,), (1,)), ((), ())),
        preferred_element_type=jnp.float32)           # (qlen, rlen) f32


def bd_scores_pallas(q4, r3):
    B, H, qlen, D = q4.shape
    rlen = r3.shape[1]
    return pl.pallas_call(
        _bd_kernel,
        grid=(B, H),
        in_specs=[pl.BlockSpec((1, 1, qlen, D), lambda b, h: (b, h, 0, 0)),
                  pl.BlockSpec((1, rlen, D), lambda b, h: (h, 0, 0))],
        out_specs=pl.BlockSpec((1, 1, qlen, rlen), lambda b, h: (b, h, 0, 0)),
        out_shape=jax.ShapeDtypeStruct((B, H, qlen, rlen), jnp.float32),
        compiler_params=pltpu.CompilerParams(
            dimension_semantics=("parallel", "parallel")),
    )(q4, r3)


# ---------------------------------------------------------------------------
# Fused attention: QK^T + shifted-BD + online softmax + P@V, klen-tiled
# ---------------------------------------------------------------------------

def _fused_attn_kernel(q_ref, k_ref, v_ref, bd_ref, o_ref, m_sc, l_sc, acc_sc):
    kv = pl.program_id(2)

    @pl.when(kv == 0)
    def _():
        m_sc[...] = jnp.full(m_sc.shape, -jnp.inf, dtype=jnp.float32)
        l_sc[...] = jnp.zeros(l_sc.shape, jnp.float32)
        acc_sc[...] = jnp.zeros(acc_sc.shape, jnp.float32)

    q = q_ref[0, 0]                                   # (qlen, D)  bf16, pre-scaled
    k = k_ref[0, 0]                                   # (tk, D)    bf16
    v = v_ref[0, 0]                                   # (tk, D)    bf16

    # content term + (pre-shifted) positional term; scores stay in VMEM only
    s = jax.lax.dot_general(q, k, (((1,), (1,)), ((), ())),
                            preferred_element_type=jnp.float32)
    s = s + bd_ref[0, 0]                              # (qlen, tk) f32

    m_prev = m_sc[...]
    m_new = jnp.maximum(m_prev, jnp.max(s, axis=-1, keepdims=True))
    alpha = jnp.exp(m_prev - m_new)
    p = jnp.exp(s - m_new)
    l_sc[...] = alpha * l_sc[...] + jnp.sum(p, axis=-1, keepdims=True)
    acc_sc[...] = alpha * acc_sc[...] + jnp.dot(
        p.astype(v.dtype), v, preferred_element_type=jnp.float32)
    m_sc[...] = m_new

    @pl.when(kv == pl.num_programs(2) - 1)
    def _():
        o_ref[0, 0] = acc_sc[...] * pl.reciprocal(l_sc[...], approx=True)


def fused_attention_pallas(q4, k4, v4, bd):
    B, H, qlen, D = q4.shape
    klen = k4.shape[2]
    tk = 512 if klen % 512 == 0 else klen             # kv tile (full at demo sizes)
    n_kv = klen // tk
    return pl.pallas_call(
        _fused_attn_kernel,
        grid=(B, H, n_kv),
        in_specs=[
            pl.BlockSpec((1, 1, qlen, D), lambda b, h, kv: (b, h, 0, 0)),
            pl.BlockSpec((1, 1, tk, D), lambda b, h, kv: (b, h, kv, 0)),
            pl.BlockSpec((1, 1, tk, D), lambda b, h, kv: (b, h, kv, 0)),
            pl.BlockSpec((1, 1, qlen, tk), lambda b, h, kv: (b, h, 0, kv)),
        ],
        out_specs=pl.BlockSpec((1, 1, qlen, D), lambda b, h, kv: (b, h, 0, 0)),
        out_shape=jax.ShapeDtypeStruct((B, H, qlen, D), jnp.float32),
        scratch_shapes=[pltpu.VMEM((qlen, 1), jnp.float32),
                        pltpu.VMEM((qlen, 1), jnp.float32),
                        pltpu.VMEM((qlen, D), jnp.float32)],
        compiler_params=pltpu.CompilerParams(
            dimension_semantics=("parallel", "parallel", "arbitrary")),
    )(q4, k4, v4, bd)


# ---------------------------------------------------------------------------
# Row-tiled residual-add + LayerNorm (nn.LayerNorm semantics, eps=1e-5)
# ---------------------------------------------------------------------------

def _add_ln_kernel(x_ref, y_ref, g_ref, b_ref, o_ref, *, eps):
    z = x_ref[...] + y_ref[...]
    mu = jnp.mean(z, axis=-1, keepdims=True)
    d = z - mu
    var = jnp.mean(d * d, axis=-1, keepdims=True)
    o_ref[...] = d * jax.lax.rsqrt(var + eps) * g_ref[...] + b_ref[...]


def add_layernorm_pallas(x, y, gamma, beta, eps=1e-5, block_rows=256):
    M, D = x.shape
    tm = block_rows if M % block_rows == 0 else M
    return pl.pallas_call(
        functools.partial(_add_ln_kernel, eps=eps),
        grid=(M // tm,),
        in_specs=[pl.BlockSpec((tm, D), lambda i: (i, 0)),
                  pl.BlockSpec((tm, D), lambda i: (i, 0)),
                  pl.BlockSpec((1, D), lambda i: (0, 0)),
                  pl.BlockSpec((1, D), lambda i: (0, 0))],
        out_specs=pl.BlockSpec((tm, D), lambda i: (i, 0)),
        out_shape=jax.ShapeDtypeStruct((M, D), jnp.float32),
        compiler_params=pltpu.CompilerParams(dimension_semantics=("parallel",)),
    )(x, y, gamma.reshape(1, D), beta.reshape(1, D))


# ---------------------------------------------------------------------------
# Glue (plain JAX): reshapes / the zero-FLOP _rel_shift permutation
# ---------------------------------------------------------------------------

def _rel_shift(x):
    """Exact Transformer-XL _rel_shift (cat + view trick) over (bsz, H, q, k)."""
    B, H, q, k = x.shape
    xp = jnp.pad(x, ((0, 0), (0, 0), (0, 0), (1, 0)))     # (B, H, q, k+1)
    xp = xp.reshape(B, H, q * (k + 1))
    return xp[:, :, q:].reshape(B, H, q, k)


def _layernorm_ref(z, g, b, eps=1e-5):
    mu = jnp.mean(z, axis=-1, keepdims=True)
    var = jnp.mean((z - mu) ** 2, axis=-1, keepdims=True)
    return (z - mu) * jax.lax.rsqrt(var + eps) * g + b


def rel_multihead_attn_forward(w, r, params, *, n_head, d_head,
                               pre_lnorm=False, use_pallas=True):
    """w: (qlen, bsz, d_model); r: (rlen, 1, d_model), rlen == klen (mems=None)."""
    qlen, bsz, d_model = w.shape
    rlen = r.shape[0]
    H, D = n_head, d_head
    scale = 1.0 / (d_head ** 0.5)

    qkv_w = params["qkv_w"]                 # (3*H*D, d_model)
    o_w = params["o_w"]                     # (d_model, H*D)
    ln_g, ln_b = params["ln_g"], params["ln_b"]

    if use_pallas:
        matmul = matmul_pallas
    else:
        matmul = lambda a, b: jnp.dot(a.astype(jnp.bfloat16), b.astype(jnp.bfloat16),
                                      preferred_element_type=jnp.float32)

    w_in = w
    if pre_lnorm:
        flat = w.reshape(qlen * bsz, d_model)
        if use_pallas:
            w_in = add_layernorm_pallas(flat, jnp.zeros_like(flat),
                                        ln_g, ln_b).reshape(w.shape)
        else:
            w_in = _layernorm_ref(w, ln_g, ln_b)

    # qkv projection (bias-free); dropout / dropatt are identity (eval mode).
    w_heads = matmul(w_in.reshape(qlen * bsz, d_model), qkv_w.T)       # (q*b, 3*H*D)
    # TODO(synk): base class defines no separate r_net; r is projected with the key
    # slice of qkv_net (only that slice is computed).
    r_heads = matmul(r.reshape(rlen, d_model), qkv_w[H * D:2 * H * D].T)  # (rlen, H*D)

    w_heads = w_heads.reshape(qlen, bsz, 3, H, D)
    q, k, v = w_heads[:, :, 0], w_heads[:, :, 1], w_heads[:, :, 2]     # (q, b, H, D)

    def to_bhqd(x):                                   # (seq, bsz, H, D) -> (bsz, H, seq, D)
        return jnp.transpose(x, (1, 2, 0, 3))

    # scale folded into q once (applies to both the content and positional terms)
    q4 = (to_bhqd(q) * scale).astype(jnp.bfloat16)
    k4 = to_bhqd(k).astype(jnp.bfloat16)
    v4 = to_bhqd(v).astype(jnp.bfloat16)
    r3 = jnp.transpose(r_heads.reshape(rlen, H, D), (1, 0, 2)).astype(jnp.bfloat16)  # (H, rlen, D)

    if use_pallas:
        bd_raw = bd_scores_pallas(q4, r3)                               # (b, H, q, rlen)
    else:
        bd_raw = jnp.einsum("bhqd,hrd->bhqr", q4, r3,
                            preferred_element_type=jnp.float32)

    bd = _rel_shift(bd_raw)                                             # zero-FLOP reindex

    if use_pallas:
        attn_vec = fused_attention_pallas(q4, k4, v4, bd)               # (b, H, q, D) f32
    else:
        ac = jnp.einsum("bhqd,bhkd->bhqk", q4, k4,
                        preferred_element_type=jnp.float32)
        p = jax.nn.softmax(ac + bd, axis=-1)
        attn_vec = jnp.einsum("bhqk,bhkd->bhqd", p.astype(jnp.bfloat16), v4,
                              preferred_element_type=jnp.float32)

    attn_vec = jnp.transpose(attn_vec, (2, 0, 1, 3)).reshape(qlen * bsz, H * D)
    attn_out = matmul(attn_vec, o_w.T)                                  # (q*b, d_model)

    w2 = w.reshape(qlen * bsz, d_model)
    if pre_lnorm:
        out = w2 + attn_out
    else:
        if use_pallas:
            out = add_layernorm_pallas(w2, attn_out, ln_g, ln_b)
        else:
            out = _layernorm_ref(w2 + attn_out, ln_g, ln_b)
    return out.reshape(qlen, bsz, d_model)


# ---------------------------------------------------------------------------
# Demo
# ---------------------------------------------------------------------------

if __name__ == "__main__":
    n_head, d_model, d_head = 2, 32, 16
    qlen, bsz = 8, 2
    klen = qlen  # mems=None

    key = jax.random.PRNGKey(0)
    k1, k2, k3, k4, k5, k6 = jax.random.split(key, 6)
    params = {
        "qkv_w": 0.2 * jax.random.normal(k1, (3 * n_head * d_head, d_model), jnp.float32),
        "o_w":   0.2 * jax.random.normal(k2, (d_model, n_head * d_head), jnp.float32),
        "ln_g":  1.0 + 0.1 * jax.random.normal(k3, (d_model,), jnp.float32),
        "ln_b":  0.1 * jax.random.normal(k4, (d_model,), jnp.float32),
    }
    w = jax.random.normal(k5, (qlen, bsz, d_model), jnp.float32)
    r = jax.random.normal(k6, (klen, 1, d_model), jnp.float32)

    out = rel_multihead_attn_forward(w, r, params, n_head=n_head, d_head=d_head,
                                     pre_lnorm=False, use_pallas=True)
    out = jax.block_until_ready(out)

    ref = rel_multihead_attn_forward(w, r, params, n_head=n_head, d_head=d_head,
                                     pre_lnorm=False, use_pallas=False)
    ref = jax.block_until_ready(ref)

    assert out.shape == (qlen, bsz, d_model)
    max_err = float(jnp.max(jnp.abs(out - ref)))
    # bf16 matmuls + approx reciprocal vs bf16 JAX reference: small rounding-order diffs
    assert max_err < 2e-2, f"mismatch vs JAX reference: {max_err}"
    print("KERNEL_OK")
</pallas_src>

<mosaic_0001>
module attributes {stable_mosaic.version = 11 : i64} {
  func.func @_matmul_kernel(%arg0: i32, %arg1: i32, %arg2: i32, %arg3: memref<16x32xbf16, #tpu.memory_space<vmem>>, %arg4: memref<32x96xbf16, #tpu.memory_space<vmem>>, %arg5: memref<16x96xf32, #tpu.memory_space<vmem>>, %arg6: memref<16x96xf32, #tpu.memory_space<vmem>>) attributes {dimension_semantics = [#tpu.dimension_semantics<parallel>, #tpu.dimension_semantics<parallel>, #tpu.dimension_semantics<arbitrary>], iteration_bounds = array<i64: 1, 1, 1>, scalar_prefetch = 0 : i64, scratch_operands = 1 : i64, tpu.core_type = #tpu.core_type<tc>, window_params = [{transform_indices = @transform_0, window_bounds = array<i64: 16, 32>}, {transform_indices = @transform_1, window_bounds = array<i64: 32, 96>}, {transform_indices = @transform_2, window_bounds = array<i64: 16, 96>}]} {
    %c0_i32 = arith.constant 0 : i32
    %0 = arith.cmpi eq, %arg2, %c0_i32 : i32
    %1 = arith.extui %0 : i1 to i32
    %c0_i32_0 = arith.constant 0 : i32
    %2 = arith.cmpi ne, %1, %c0_i32_0 : i32
    scf.if %2 {
      %cst_10 = arith.constant 0.000000e+00 : f32
      %12 = vector.broadcast %cst_10 : f32 to vector<16x96xf32>
      %c0_11 = arith.constant 0 : index
      %c0_12 = arith.constant 0 : index
      %13 = vector.load %arg6[%c0_11, %c0_12] : memref<16x96xf32, #tpu.memory_space<vmem>>, vector<16x96xf32>
      tpu.vector_store %arg6[%c0_11, %c0_12], %12 {strides = array<i32>} : memref<16x96xf32, #tpu.memory_space<vmem>>, vector<16x96xf32>,
    } else {
    }
    %c0 = arith.constant 0 : index
    %c0_1 = arith.constant 0 : index
    %3 = vector.load %arg6[%c0, %c0_1] : memref<16x96xf32, #tpu.memory_space<vmem>>, vector<16x96xf32>
    %c0_2 = arith.constant 0 : index
    %c0_3 = arith.constant 0 : index
    %4 = vector.load %arg3[%c0_2, %c0_3] : memref<16x32xbf16, #tpu.memory_space<vmem>>, vector<16x32xbf16>
    %c0_4 = arith.constant 0 : index
    %c0_5 = arith.constant 0 : index
    %5 = vector.load %arg4[%c0_4, %c0_5] : memref<32x96xbf16, #tpu.memory_space<vmem>>, vector<32x96xbf16>
    %cst = arith.constant dense<0.000000e+00> : vector<16x96xf32>
    %6 = tpu.matmul %4, %5, %cst {dimension_numbers = #tpu.dot_dimension_numbers<[1], [0], [0], [1], [0, 0, 1, 1], [], []>} : vector<16x32xbf16>, vector<32x96xbf16>, vector<16x96xf32> -> vector<16x96xf32>
    %7 = arith.addf %3, %6 : vector<16x96xf32>
    %c0_6 = arith.constant 0 : index
    %c0_7 = arith.constant 0 : index
    %8 = vector.load %arg6[%c0_6, %c0_7] : memref<16x96xf32, #tpu.memory_space<vmem>>, vector<16x96xf32>
    tpu.vector_store %arg6[%c0_6, %c0_7], %7 {strides = array<i32>} : memref<16x96xf32, #tpu.memory_space<vmem>>, vector<16x96xf32>,
    %c0_i32_8 = arith.constant 0 : i32
    %9 = arith.cmpi eq, %arg2, %c0_i32_8 : i32
    %10 = arith.extui %9 : i1 to i32
    %c0_i32_9 = arith.constant 0 : i32
    %11 = arith.cmpi ne, %10, %c0_i32_9 : i32
    scf.if %11 {
      %c0_10 = arith.constant 0 : index
      %c0_11 = arith.constant 0 : index
      %12 = vector.load %arg6[%c0_10, %c0_11] : memref<16x96xf32, #tpu.memory_space<vmem>>, vector<16x96xf32>
      %c0_12 = arith.constant 0 : index
      %c0_13 = arith.constant 0 : index
      %13 = vector.load %arg5[%c0_12, %c0_13] : memref<16x96xf32, #tpu.memory_space<vmem>>, vector<16x96xf32>
      tpu.vector_store %arg5[%c0_12, %c0_13], %12 {strides = array<i32>} : memref<16x96xf32, #tpu.memory_space<vmem>>, vector<16x96xf32>,
    } else {
    }
    return
  }
  func.func @transform_0(%arg0: i32, %arg1: i32, %arg2: i32) -> (i32, i32) {
    %c0_i32 = arith.constant 0 : i32
    return %arg0, %arg2 : i32, i32
  }
  func.func @transform_1(%arg0: i32, %arg1: i32, %arg2: i32) -> (i32, i32) {
    %c0_i32 = arith.constant 0 : i32
    return %arg2, %arg1 : i32, i32
  }
  func.func @transform_2(%arg0: i32, %arg1: i32, %arg2: i32) -> (i32, i32) {
    %c0_i32 = arith.constant 0 : i32
    return %arg0, %arg1 : i32, i32
  }
}

</mosaic_0001>

<bundles_post_ra>
// kernel: tpu_custom_call.1
= control target key start
LH: loop header
LB: loop body
LE: loop exit
PB: predicated region body
PF: predicated region fallthrough
CT: control target
= control target key end

     0   :  { %7 = vsyncpa [#allocation4], 0  ;;  %s280_s0 = inlined_call_operand.hbm [shape: bf16[16,32], index: 0, kind: input, shape index: {}]   ;;  %s281_s1 = inlined_call_operand.hbm [shape: bf16[32,96], index: 1, kind: input, shape index: {}]   ;;  %s282_s2 = inlined_call_operand.hbm [shape: f32[16,96], index: 2, kind: output, shape index: {}]  }
   0x1   :  { %8 = vsyncpa [#allocation7], 0 }
   0x2   :  { %9 = vsyncpa [#allocation5], 0  ;;  %s241_s9 = smov [#allocation3]  }
   0x3   :  { %s15_s10 = sshll.u32 %s241_s9, 4  ;;  %s16_s10 = int_to_ptr.vmem [resolvable:$true] %s15_s10 }
   0x4   :  { %s183_s11 = scalar_lea.vmem %s16_s10, 128  ;;  %p188_p1 = scmp.lt.s32.totalorder %s16_s10, %s16_s10 }
   0x5   :  { %p184_p0 = scmp.ne.s32.totalorder %s16_s10, %s183_s11  ;;  %p189_p2 = scmp.lt.s32.totalorder %s183_s11, %s183_s11 }
   0x7   :  { %p190_p3 = por %p189_p2, %p188_p1 }
   0x9   :  { %p191_p4 = pnand %p190_p3, %p184_p0 }
   0xb   :  { %194 = shalt.err (!%p191_p4)
}
   0xc   :  { %s242_s12 = smov 64   ;;  %s243_s13 = smov 4  }
   0xd   :  { %21 = dma.hbm_to_vmem [thread:$0]  %s280_s0, 128, %s16_s10, [#allocation4], %s242_s12, %s242_s12, %s243_s13  }
   0xe   :  { %s244_s16 = smov [#allocation6]  }
   0xf   :  { %s27_s17 = sshll.u32 %s244_s16, 4  ;;  %s28_s17 = int_to_ptr.vmem [resolvable:$true] %s27_s17 }
  0x10   :  { %s203_s18 = scalar_lea.vmem %s28_s17, 256  ;;  %p208_p6 = scmp.lt.s32.totalorder %s28_s17, %s28_s17 }
  0x11   :  { %p204_p5 = scmp.ne.s32.totalorder %s28_s17, %s203_s18  ;;  %p209_p7 = scmp.lt.s32.totalorder %s203_s18, %s203_s18 }
  0x13   :  { %p210_p8 = por %p209_p7, %p208_p6 }
  0x15   :  { %p211_p9 = pnand %p210_p8, %p204_p5 }
  0x17   :  { %214 = shalt.err (!%p211_p9)
}
  0x18   :  { %33 = dma.hbm_to_vmem [thread:$0]  %s281_s1, 256, %s28_s17, [#allocation7], %s242_s12, %s242_s12, %s243_s13  }
  0x19   :  { %235 = dma.done.wait [#allocation4], 128  }
  0x1a   :  { %236 = vsyncadd [#allocation4], 4294967168 }
  0x1b   :  { %237 = dma.done.wait [#allocation7], 256  }
  0x1c   :  { %238 = vsyncadd [#allocation7], 4294967040  ;;  %vm45_vm0 = vcmask 785408   ;;  %v245_v0 = vmov 0.0   ;;  %vm246_vm1 = vmmov 0   ;;  %v172_v1 = vld [vmem:[#allocation6 + $0x8] sm:$0xff]  }
  0x1d   :  { %46 = vst.msk [vmem:[#allocation2] sm:$0xff] %vm45_vm0, %v245_v0  ;;  %47 = vst.msk [vmem:[#allocation2 + $0x8] sm:$0xff] %vm45_vm0, %v245_v0  ;;  %155 = vmatprep.subr.bf16.mxu0 %v245_v0  ;;  %159 = vmatprep.mubr.msk.bf16.mxu0 %vm246_vm1, %v245_v0  ;;  %v173_v2 = vld [vmem:[#allocation6] sm:$0xff]   ;;  %v174_v3 = vld [vmem:[#allocation3] sm:$0xff]   ;;  %vm73_vm2 = vcmask 261120   ;;  %s247_s0 = smov [#allocation8]  }
  0x1e   :  { %156 = vmatpush3.bf16.msra.mxu0 %v172_v1  ;;  %s135_s1 = sshll.u32 %s247_s0, 4  ;;  %s136_s1 = int_to_ptr.vmem [resolvable:$true] %s135_s1 }
  0x1f   :  { %157 = vmatprep.subr.bf16.mxu0 %v245_v0  ;;  %s215_s21 = scalar_lea.vmem %s136_s1, 256  ;;  %p220_p11 = scmp.lt.s32.totalorder %s136_s1, %s136_s1 }
  0x20   :  { %p216_p10 = scmp.ne.s32.totalorder %s136_s1, %s215_s21  ;;  %p221_p12 = scmp.lt.s32.totalorder %s215_s21, %s215_s21 }
  0x22   :  { %158 = vmatpush3.bf16.msra.mxu0 %v173_v2  ;;  %p222_p13 = por %p221_p12, %p220_p11 }
  0x24   :  { %v48_v4 = vld [vmem:[#allocation2] sm:$0xff]  ;;  %v49_v8 = vld [vmem:[#allocation2 + $0x8] sm:$0xff]  ;;  %p223_p0 = pnand %p222_p13, %p216_p10 }
  0x25   :  { %160 = vmatmul.mubr.msk.bf16.vlgmr.msra.gmra.mxu0 %vm73_vm2, %v174_v3 }
  0xe5   :  { %v111_v5 = vpop.f32.mrf.mxu0 }
  0xe6   :  { %v118_v6 = vadd.f32 %v111_v5, %v48_v4 }
  0xe7   :  { %v161_v7 = vpop.f32.mrf.mxu0 }
  0xe8   :  { %121 = vst.msk [vmem:[#allocation2] sm:$0xff] %vm45_vm0, %v118_v6 }
  0xe9   :  { %v114_v9 = vpop.f32.mrf.mxu0 }
  0xea   :  { %v119_v10 = vadd.f32 %v114_v9, %v49_v8 }
  0xeb   :  { %v162_v11 = vpop.f32.mrf.mxu0 }
  0xec   :  { %122 = vst.msk [vmem:[#allocation2 + $0x8] sm:$0xff] %vm45_vm0, %v119_v10 }
  0xef   :  { %v126_v12 = vld [vmem:[#allocation2] sm:$0xff] }
  0xf0   :  { %128 = vst.msk [vmem:[#allocation8] sm:$0xff] %vm45_vm0, %v126_v12 }
  0xf3   :  { %v127_v13 = vld [vmem:[#allocation2 + $0x8] sm:$0xff] }
  0xf4   :  { %129 = vst.msk [vmem:[#allocation8 + $0x8] sm:$0xff] %vm45_vm0, %v127_v13 }
  0xf5   :  { %226 = shalt.err (!%p223_p0)
}
  0xf6   :  { %s248_s22 = smov 128   ;;  %s249_s23 = smov 8  }
  0xf7   :  { %141 = dma.vmem_to_hbm [thread:$0]  %s136_s1, 256, %s282_s2, [#allocation5], %s248_s22, %s248_s22, %s249_s23  }
  0xf8   :  { %239 = dma.done.wait [#allocation5], 256  }
  0xf9   :  { %240 = vsyncadd [#allocation5], 4294967040 }
  0xfa   :  { %145 = vsyncpa [#allocation4], 1 }
  0xfb   :  { %146 = vsyncpa [#allocation7], 1 }
  0xfc   :  { %147 = vsyncpa [#allocation5], 1 }

</bundles_post_ra>
